<compile_context>
chip_gen: v7x
topology: tpu7x:2x2x1
jax: 0.10.0
libtpu: 0.0.40
codegen_flags: <defaults>
</compile_context>

<pallas_src>
import jax
import jax.numpy as jnp
from jax.experimental import pallas as pl
from jax.experimental.pallas import tpu as pltpu

HIDDEN = 64
FUSED = 2 * HIDDEN  # 128 lanes: actor in [0, 64), critic in [64, 128)


def _mlp_base_kernel(
    x_ref,
    w1_ref, b1_ref,        # fused layer 1: (num_inputs, 128), (1, 128)
    w2_ref, b2_ref,        # fused block-diag layer 2: (128, 128), (1, 128)
    wclp_ref, bcl_ref,     # zero-padded value head row (1, 128), bias (1, 1)
    out_ref,               # lane-dense slab (tb, 128)
):
    x = x_ref[...]

    # Fused layer 1: one matmul, one bias add, one tanh for both trunks.
    h1 = jnp.tanh(
        jnp.dot(x, w1_ref[...], preferred_element_type=jnp.float32) + b1_ref[...]
    )

    # Fused layer 2 (block-diagonal). Cast h1 to the weight dtype so the bf16
    # path stays bf16 on the MXU while accumulating in f32.
    h2 = jnp.tanh(
        jnp.dot(h1.astype(w2_ref.dtype), w2_ref[...],
                preferred_element_type=jnp.float32)
        + b2_ref[...]
    )

    # Value head: VPU multiply + lane reduction (wclp is zero over the actor
    # lanes, so this is exactly hidden_critic @ wcl + bcl).
    value = jnp.sum(h2 * wclp_ref[...], axis=-1, keepdims=True) + bcl_ref[...]

    # Single lane-dense store: actor hidden in lanes [0, 64), value broadcast
    # across lanes [64, 128).
    lane = jax.lax.broadcasted_iota(jnp.int32, h2.shape, 1)
    out_ref[...] = jnp.where(lane < HIDDEN, h2, value)


def _pick_batch_tile(b):
    if b <= 256:
        return b
    for tb in (512, 256, 128, 64, 32, 16, 8):
        if b % tb == 0:
            return tb
    return b


def mlp_base_forward(inputs, states, masks, fused_params, *, use_bf16=False):
    """Pallas implementation of MLPBase.forward.

    Returns (value, hidden_actor, states) matching the PyTorch module.
    `masks` is unused by the reference forward.
    """
    del masks  # not used in MLPBase.forward
    B, num_inputs = inputs.shape

    w1, b1 = fused_params["w1"], fused_params["b1"]
    w2, b2 = fused_params["w2"], fused_params["b2"]
    wclp, bcl = fused_params["wclp"], fused_params["bcl"]

    if use_bf16:
        # bf16 MXU operands (v6e/v7x native); biases / head row stay f32 and
        # accumulation is f32 via preferred_element_type.
        x_k = inputs.astype(jnp.bfloat16)
        w1 = w1.astype(jnp.bfloat16)
        w2 = w2.astype(jnp.bfloat16)
    else:
        x_k = inputs

    tb = _pick_batch_tile(B)
    grid = (B // tb,)

    def resident(arr):
        # Weights/biases: same block at every grid step -> stay VMEM-resident.
        return pl.BlockSpec(arr.shape, lambda i: (0, 0))

    slab = pl.pallas_call(
        _mlp_base_kernel,
        grid=grid,
        out_shape=jax.ShapeDtypeStruct((B, FUSED), jnp.float32),
        in_specs=[
            pl.BlockSpec((tb, num_inputs), lambda i: (i, 0)),
            resident(w1), resident(b1),
            resident(w2), resident(b2),
            resident(wclp), resident(bcl),
        ],
        out_specs=pl.BlockSpec((tb, FUSED), lambda i: (i, 0)),
        compiler_params=pltpu.CompilerParams(
            dimension_semantics=("parallel",)),
    )(x_k, w1, b1, w2, b2, wclp, bcl)

    hidden_actor = slab[:, :HIDDEN]
    value = slab[:, HIDDEN:HIDDEN + 1]
    return value, hidden_actor, states


def init_normc(key, fan_in, fan_out):
    """Deterministic equivalent of init_normc_: N(0,1) normalized per output row.

    PyTorch Linear weight is (out, in); init_normc_ normalizes over dim=1 (in).
    We return the transposed (in, out) layout for the kernel.
    """
    w = jax.random.normal(key, (fan_out, fan_in), dtype=jnp.float32)
    w = w / jnp.sqrt(jnp.sum(w * w, axis=1, keepdims=True))
    return w.T  # (in, out)


def make_raw_params(key, num_inputs):
    keys = jax.random.split(key, 5)
    return {
        "w1c": init_normc(keys[0], num_inputs, HIDDEN),
        "b1c": jnp.zeros((1, HIDDEN), jnp.float32),
        "w2c": init_normc(keys[1], HIDDEN, HIDDEN),
        "b2c": jnp.zeros((1, HIDDEN), jnp.float32),
        "wcl": init_normc(keys[2], HIDDEN, 1),
        "bcl": jnp.zeros((1, 1), jnp.float32),
        "w1a": init_normc(keys[3], num_inputs, HIDDEN),
        "b1a": jnp.zeros((1, HIDDEN), jnp.float32),
        "w2a": init_normc(keys[4], HIDDEN, HIDDEN),
        "b2a": jnp.zeros((1, HIDDEN), jnp.float32),
    }
    # TODO(synk): self.dist (action distribution head) is constructed in
    # __init__ but not used in forward(), so it is intentionally omitted.


def fuse_params(p):
    """One-time wrapper-side fusion (done once, reused across all calls)."""
    z = jnp.zeros((HIDDEN, HIDDEN), jnp.float32)
    fused = {
        # layer 1: actor lanes [0,64), critic lanes [64,128)
        "w1": jnp.concatenate([p["w1a"], p["w1c"]], axis=1),      # (in, 128)
        "b1": jnp.concatenate([p["b1a"], p["b1c"]], axis=1),      # (1, 128)
        # layer 2: block-diagonal so trunks stay independent
        "w2": jnp.concatenate(
            [jnp.concatenate([p["w2a"], z], axis=1),
             jnp.concatenate([z, p["w2c"]], axis=1)], axis=0),    # (128, 128)
        "b2": jnp.concatenate([p["b2a"], p["b2c"]], axis=1),      # (1, 128)
        # value head row, zero over actor lanes
        "wclp": jnp.concatenate(
            [jnp.zeros((1, HIDDEN), jnp.float32), p["wcl"].T], axis=1),  # (1,128)
        "bcl": p["bcl"],                                          # (1, 1)
    }
    return fused


def reference_forward(inputs, states, p):
    hc = jnp.tanh(inputs @ p["w1c"] + p["b1c"])
    hc = jnp.tanh(hc @ p["w2c"] + p["b2c"])
    value = hc @ p["wcl"] + p["bcl"]
    ha = jnp.tanh(inputs @ p["w1a"] + p["b1a"])
    ha = jnp.tanh(ha @ p["w2a"] + p["b2a"])
    return value, ha, states


if __name__ == "__main__":
    key = jax.random.PRNGKey(0)
    k_x, k_s, k_p = jax.random.split(key, 3)

    B, NUM_INPUTS = 8, 32
    inputs = jax.random.normal(k_x, (B, NUM_INPUTS), dtype=jnp.float32)
    states = jax.random.normal(k_s, (B, 1), dtype=jnp.float32)  # state_size == 1
    masks = jnp.ones((B, 1), dtype=jnp.float32)

    raw_params = make_raw_params(k_p, NUM_INPUTS)
    fused_params = fuse_params(raw_params)

    # f32 path (exact match to the reference).
    value, hidden_actor, states_out = mlp_base_forward(
        inputs, states, masks, fused_params, use_bf16=False)
    jax.block_until_ready((value, hidden_actor, states_out))

    ref_value, ref_ha, ref_states = reference_forward(inputs, states, raw_params)
    assert value.shape == (B, 1) and hidden_actor.shape == (B, HIDDEN)
    assert jnp.allclose(value, ref_value, atol=1e-5, rtol=1e-5)
    assert jnp.allclose(hidden_actor, ref_ha, atol=1e-5, rtol=1e-5)
    assert jnp.array_equal(states_out, ref_states)

    # bf16-operand path (v6e/v7x MXU-native) — looser tolerance, f32 accumulate.
    value_bf, ha_bf, _ = mlp_base_forward(
        inputs, states, masks, fused_params, use_bf16=True)
    jax.block_until_ready((value_bf, ha_bf))
    assert jnp.allclose(value_bf, ref_value, atol=5e-2, rtol=5e-2)
    assert jnp.allclose(ha_bf, ref_ha, atol=5e-2, rtol=5e-2)

    print("KERNEL_OK")
</pallas_src>

<mosaic_0001>
module attributes {stable_mosaic.version = 11 : i64} {
  func.func @_mlp_base_kernel(%arg0: i32, %arg1: memref<8x32xf32, #tpu.memory_space<vmem>>, %arg2: memref<32x128xf32, #tpu.memory_space<vmem>>, %arg3: memref<1x128xf32, #tpu.memory_space<vmem>>, %arg4: memref<128x128xf32, #tpu.memory_space<vmem>>, %arg5: memref<1x128xf32, #tpu.memory_space<vmem>>, %arg6: memref<1x128xf32, #tpu.memory_space<vmem>>, %arg7: memref<1x1xf32, #tpu.memory_space<vmem>>, %arg8: memref<8x128xf32, #tpu.memory_space<vmem>>) attributes {dimension_semantics = [#tpu.dimension_semantics<parallel>], iteration_bounds = array<i64: 1>, scalar_prefetch = 0 : i64, scratch_operands = 0 : i64, tpu.core_type = #tpu.core_type<tc>, window_params = [{transform_indices = @transform_0, window_bounds = array<i64: 8, 32>}, {pipeline_mode = #tpu.pipeline_mode<synchronous>, transform_indices = @transform_1, window_bounds = array<i64: 32, 128>}, {pipeline_mode = #tpu.pipeline_mode<synchronous>, transform_indices = @transform_2, window_bounds = array<i64: 1, 128>}, {pipeline_mode = #tpu.pipeline_mode<synchronous>, transform_indices = @transform_3, window_bounds = array<i64: 128, 128>}, {pipeline_mode = #tpu.pipeline_mode<synchronous>, transform_indices = @transform_4, window_bounds = array<i64: 1, 128>}, {pipeline_mode = #tpu.pipeline_mode<synchronous>, transform_indices = @transform_5, window_bounds = array<i64: 1, 128>}, {pipeline_mode = #tpu.pipeline_mode<synchronous>, transform_indices = @transform_6, window_bounds = array<i64: 1, 1>}, {transform_indices = @transform_7, window_bounds = array<i64: 8, 128>}]} {
    %c0 = arith.constant 0 : index
    %c0_0 = arith.constant 0 : index
    %0 = vector.load %arg1[%c0, %c0_0] : memref<8x32xf32, #tpu.memory_space<vmem>>, vector<8x32xf32>
    %c0_1 = arith.constant 0 : index
    %c0_2 = arith.constant 0 : index
    %1 = vector.load %arg2[%c0_1, %c0_2] : memref<32x128xf32, #tpu.memory_space<vmem>>, vector<32x128xf32>
    %cst = arith.constant dense<0.000000e+00> : vector<8x128xf32>
    %2 = tpu.matmul %0, %1, %cst {dimension_numbers = #tpu.dot_dimension_numbers<[1], [0], [0], [1], [0, 0, 1, 1], [], []>} : vector<8x32xf32>, vector<32x128xf32>, vector<8x128xf32> -> vector<8x128xf32>
    %c0_3 = arith.constant 0 : index
    %c0_4 = arith.constant 0 : index
    %3 = vector.load %arg3[%c0_3, %c0_4] : memref<1x128xf32, #tpu.memory_space<vmem>>, vector<1x128xf32>
    %4 = vector.broadcast %3 : vector<1x128xf32> to vector<8x128xf32>
    %5 = arith.addf %2, %4 : vector<8x128xf32>
    %6 = math.tanh %5 : vector<8x128xf32>
    %c0_5 = arith.constant 0 : index
    %c0_6 = arith.constant 0 : index
    %7 = vector.load %arg4[%c0_5, %c0_6] : memref<128x128xf32, #tpu.memory_space<vmem>>, vector<128x128xf32>
    %cst_7 = arith.constant dense<0.000000e+00> : vector<8x128xf32>
    %8 = tpu.matmul %6, %7, %cst_7 {dimension_numbers = #tpu.dot_dimension_numbers<[1], [0], [0], [1], [0, 0, 1, 1], [], []>} : vector<8x128xf32>, vector<128x128xf32>, vector<8x128xf32> -> vector<8x128xf32>
    %c0_8 = arith.constant 0 : index
    %c0_9 = arith.constant 0 : index
    %9 = vector.load %arg5[%c0_8, %c0_9] : memref<1x128xf32, #tpu.memory_space<vmem>>, vector<1x128xf32>
    %10 = vector.broadcast %9 : vector<1x128xf32> to vector<8x128xf32>
    %11 = arith.addf %8, %10 : vector<8x128xf32>
    %12 = math.tanh %11 : vector<8x128xf32>
    %c0_10 = arith.constant 0 : index
    %c0_11 = arith.constant 0 : index
    %13 = vector.load %arg6[%c0_10, %c0_11] : memref<1x128xf32, #tpu.memory_space<vmem>>, vector<1x128xf32>
    %14 = vector.broadcast %13 : vector<1x128xf32> to vector<8x128xf32>
    %15 = arith.mulf %12, %14 : vector<8x128xf32>
    %cst_12 = arith.constant dense<0.000000e+00> : vector<8xf32>
    %16 = vector.multi_reduction <add>, %15, %cst_12 [1] : vector<8x128xf32> to vector<8xf32>
    %17 = vector.shape_cast %16 : vector<8xf32> to vector<8x1xf32>
    %c0_13 = arith.constant 0 : index
    %c0_14 = arith.constant 0 : index
    %18 = vector.load %arg7[%c0_13, %c0_14] : memref<1x1xf32, #tpu.memory_space<vmem>>, vector<1x1xf32>
    %19 = vector.broadcast %18 : vector<1x1xf32> to vector<8x1xf32>
    %20 = arith.addf %17, %19 : vector<8x1xf32>
    %21 = tpu.iota {dimensions = array<i32: 1>} : vector<8x128xi32>
    %c64_i32 = arith.constant 64 : i32
    %22 = vector.broadcast %c64_i32 : i32 to vector<8x128xi32>
    %23 = arith.cmpi slt, %21, %22 : vector<8x128xi32>
    %24 = vector.shape_cast %20 : vector<8x1xf32> to vector<8x1xf32>
    %25 = vector.broadcast %24 : vector<8x1xf32> to vector<8x128xf32>
    %26 = arith.select %23, %12, %25 : vector<8x128xi1>, vector<8x128xf32>
    %c0_15 = arith.constant 0 : index
    %c0_16 = arith.constant 0 : index
    %27 = vector.load %arg8[%c0_15, %c0_16] : memref<8x128xf32, #tpu.memory_space<vmem>>, vector<8x128xf32>
    tpu.vector_store %arg8[%c0_15, %c0_16], %26 {strides = array<i32>} : memref<8x128xf32, #tpu.memory_space<vmem>>, vector<8x128xf32>,
    return
  }
  func.func @transform_0(%arg0: i32) -> (i32, i32) {
    %c0_i32 = arith.constant 0 : i32
    %c0_i32_0 = arith.constant 0 : i32
    return %arg0, %c0_i32 : i32, i32
  }
  func.func @transform_1(%arg0: i32) -> (i32, i32) {
    %c0_i32 = arith.constant 0 : i32
    %c0_i32_0 = arith.constant 0 : i32
    %c0_i32_1 = arith.constant 0 : i32
    return %c0_i32, %c0_i32_0 : i32, i32
  }
  func.func @transform_2(%arg0: i32) -> (i32, i32) {
    %c0_i32 = arith.constant 0 : i32
    %c0_i32_0 = arith.constant 0 : i32
    %c0_i32_1 = arith.constant 0 : i32
    return %c0_i32, %c0_i32_0 : i32, i32
  }
  func.func @transform_3(%arg0: i32) -> (i32, i32) {
    %c0_i32 = arith.constant 0 : i32
    %c0_i32_0 = arith.constant 0 : i32
    %c0_i32_1 = arith.constant 0 : i32
    return %c0_i32, %c0_i32_0 : i32, i32
  }
  func.func @transform_4(%arg0: i32) -> (i32, i32) {
    %c0_i32 = arith.constant 0 : i32
    %c0_i32_0 = arith.constant 0 : i32
    %c0_i32_1 = arith.constant 0 : i32
    return %c0_i32, %c0_i32_0 : i32, i32
  }
  func.func @transform_5(%arg0: i32) -> (i32, i32) {
    %c0_i32 = arith.constant 0 : i32
    %c0_i32_0 = arith.constant 0 : i32
    %c0_i32_1 = arith.constant 0 : i32
    return %c0_i32, %c0_i32_0 : i32, i32
  }
  func.func @transform_6(%arg0: i32) -> (i32, i32) {
    %c0_i32 = arith.constant 0 : i32
    %c0_i32_0 = arith.constant 0 : i32
    %c0_i32_1 = arith.constant 0 : i32
    return %c0_i32, %c0_i32_0 : i32, i32
  }
  func.func @transform_7(%arg0: i32) -> (i32, i32) {
    %c0_i32 = arith.constant 0 : i32
    %c0_i32_0 = arith.constant 0 : i32
    return %arg0, %c0_i32 : i32, i32
  }
}

</mosaic_0001>

<bundles_post_ra>
// kernel: tpu_custom_call.1
= control target key start
LH: loop header
LB: loop body
LE: loop exit
PB: predicated region body
PF: predicated region fallthrough
CT: control target
= control target key end

     0   :  { %s621_s0 = inlined_call_operand.hbm [shape: f32[8,32], index: 0, kind: input, shape index: {}]   ;;  %s622_s1 = inlined_call_operand.hbm [shape: f32[32,128], index: 1, kind: input, shape index: {}]   ;;  %s623_s2 = inlined_call_operand.vmem [shape: f32[1,128], index: 2, kind: input, shape index: {}]   ;;  %s624_s3 = inlined_call_operand.hbm [shape: f32[128,128], index: 3, kind: input, shape index: {}]   ;;  %s625_s4 = inlined_call_operand.vmem [shape: f32[1,128], index: 4, kind: input, shape index: {}]   ;;  %s626_s5 = inlined_call_operand.vmem [shape: f32[1,128], index: 5, kind: input, shape index: {}]   ;;  %s627_s6 = inlined_call_operand.<no memory space> [shape: f32[1,1], index: 6, kind: input, shape index: {}]   ;;  %s628_s7 = inlined_call_operand.hbm [shape: f32[8,128], index: 7, kind: output, shape index: {}]  }
   0x1   :  { %v12_v0 = vstv %s627_s6 }
   0x2   :  { %13 = vst [vmem:[#allocation2] sm:$0x1] %v12_v0 }
   0x3   :  { %14 = vsyncpa [#allocation4], 0 }
   0x4   :  { %15 = vsyncpa [#allocation7], 0 }
   0x5   :  { %16 = vsyncpa [#allocation5], 0  ;;  %s505_s26 = smov [#allocation6]   ;;  %s411_s30 = scalar_lea.hbm %s622_s1, 512 }
   0x6   :  { %s32_s27 = sshll.u32 %s505_s26, 4  ;;  %p412_p0 = scmp.ne.s32.totalorder %s622_s1, %s411_s30  ;;  %s33_s27 = int_to_ptr.vmem [resolvable:$true] %s32_s27 }
   0x7   :  { %p415_p1 = scmp.lt.u32.totalorder %s411_s30, %s622_s1 }
   0x9   :  { %p417_p2 = pnand %p415_p1, %p412_p0 }
   0xb   :  { %420 = shalt.err (!%p417_p2)
}
   0xc   :  { %s421_s6 = scalar_lea.vmem %s33_s27, 512  ;;  %p426_p4 = scmp.lt.s32.totalorder %s33_s27, %s33_s27 }
   0xd   :  { %p422_p3 = scmp.ne.s32.totalorder %s33_s27, %s421_s6  ;;  %p427_p5 = scmp.lt.s32.totalorder %s421_s6, %s421_s6 }
   0xf   :  { %p428_p6 = por %p427_p5, %p426_p4 }
  0x11   :  { %p429_p7 = pnand %p428_p6, %p422_p3 }
  0x13   :  { %432 = shalt.err (!%p429_p7)
}
  0x14   :  { %s506_s12 = smov 128   ;;  %s507_s13 = smov 8  }
  0x15   :  { %38 = dma.hbm_to_vmem [thread:$0]  %s622_s1, 512, %s33_s27, [#allocation7], %s506_s12, %s506_s12, %s507_s13  }
  0x16   :  { %s508_s16 = smov [#allocation3]   ;;  %s509_s18 = smov [#allocation8]  }
  0x17   :  { %s23_s17 = sshll.u32 %s508_s16, 4  ;;  %s46_s19 = sshll.u32 %s509_s18, 4  ;;  %s24_s17 = int_to_ptr.vmem [resolvable:$true] %s23_s17  ;;  %s47_s19 = int_to_ptr.vmem [resolvable:$true] %s46_s19 }
  0x18   :  { %s433_s22 = scalar_lea.hbm %s621_s0, 128 }
  0x19   :  { %p434_p8 = scmp.ne.s32.totalorder %s621_s0, %s433_s22  ;;  %p437_p9 = scmp.lt.u32.totalorder %s433_s22, %s621_s0 }
  0x1b   :  { %p439_p10 = pnand %p437_p9, %p434_p8 }
  0x1d   :  { %442 = shalt.err (!%p439_p10)
}
  0x1e   :  { %s443_s1 = scalar_lea.vmem %s24_s17, 128  ;;  %p448_p12 = scmp.lt.s32.totalorder %s24_s17, %s24_s17 }
  0x1f   :  { %p444_p11 = scmp.ne.s32.totalorder %s24_s17, %s443_s1  ;;  %p449_p13 = scmp.lt.s32.totalorder %s443_s1, %s443_s1 }
  0x21   :  { %p450_p0 = por %p449_p13, %p448_p12 }
  0x23   :  { %p451_p1 = pnand %p450_p0, %p444_p11 }
  0x25   :  { %454 = shalt.err (!%p451_p1)
}
  0x26   :  { %26 = dma.hbm_to_vmem [thread:$0]  %s621_s0, 128, %s24_s17, [#allocation4]  }
  0x27   :  { %s455_s8 = scalar_lea.hbm %s624_s3, 2048 }
  0x28   :  { %p456_p2 = scmp.ne.s32.totalorder %s624_s3, %s455_s8  ;;  %p459_p3 = scmp.lt.u32.totalorder %s455_s8, %s624_s3 }
  0x2a   :  { %p461_p4 = pnand %p459_p3, %p456_p2 }
  0x2c   :  { %464 = shalt.err (!%p461_p4)
}
  0x2d   :  { %s465_s14 = scalar_lea.vmem %s47_s19, 2048  ;;  %p470_p6 = scmp.lt.s32.totalorder %s47_s19, %s47_s19 }
  0x2e   :  { %p466_p5 = scmp.ne.s32.totalorder %s47_s19, %s465_s14  ;;  %p471_p7 = scmp.lt.s32.totalorder %s465_s14, %s465_s14 }
  0x30   :  { %p472_p8 = por %p471_p7, %p470_p6 }
  0x32   :  { %p473_p9 = pnand %p472_p8, %p466_p5 }
  0x34   :  { %476 = shalt.err (!%p473_p9)
}
  0x35   :  { %52 = dma.hbm_to_vmem [thread:$0]  %s624_s3, 2048, %s47_s19, [#allocation7], %s506_s12, %s506_s12, %s507_s13  }
  0x36   :  { %499 = dma.done.wait [#allocation4], 128  }
  0x37   :  { %500 = vsyncadd [#allocation4], 4294967168 }
  0x38   :  { %501 = dma.done.wait [#allocation7], 2560  }
  0x39   :  { %502 = vsyncadd [#allocation7], 4294964736  ;;  %v510_v1 = vmov 0.0|0.0   ;;  %vm511_vm0 = vmmov 0   ;;  %v512_v2 = vmov 0.0   ;;  %v69_v3 = vld [vmem:[#allocation6] sm:$0xff]  ;;  %v267_v50 = vlaneseq }
  0x3a   :  { %366 = vmatprep.subr.bf16.mxu0 %v510_v1  ;;  %328 = vmatprep.mubr.msk.f32.mxu0 %vm511_vm0, %v512_v2  ;;  %v70_v4 = vld [vmem:[#allocation6 + $0x8] sm:$0xff]  ;;  %v71_v5 = vld [vmem:[#allocation6 + $0x10] sm:$0xff]  ;;  %v72_v7 = vld [vmem:[#allocation6 + $0x18] sm:$0xff]  ;;  %vm80_vm1 = vcmask 261120   ;;  %v513_v46 = vmov 0  }
  0x3b   :  { %372 = vmatprep.subr.bf16.mxu1 %v510_v1  ;;  %363 = vmatprep.mubr.msk.f32.mxu1 %vm511_vm0, %v512_v2  ;;  %v367_v6 = vpack.c.bf16 %v70_v4, %v69_v3  ;;  %v155_v8 = vld [vmem:[#allocation8] sm:$0xff]  ;;  %v156_v9 = vld [vmem:[#allocation8 + $0x8] sm:$0xff]  ;;  %v157_v10 = vld [vmem:[#allocation8 + $0x10] sm:$0xff]  ;;  %v370_v12 = vpack.c.bf16 %v72_v7, %v71_v5  ;;  %v268_v51 = vand.u32 127, %v267_v50 }
  0x3c   :  { %v158_v11 = vld [vmem:[#allocation8 + $0x18] sm:$0xff]  ;;  %v373_v13 = vpack.c.bf16 %v156_v9, %v155_v8  ;;  %v159_v15 = vld [vmem:[#allocation8 + $0x20] sm:$0xff]  ;;  %v160_v16 = vld [vmem:[#allocation8 + $0x28] sm:$0xff]  ;;  %406 = vset.pattern.permute.xlu0 %v513_v46 }
  0x3d   :  { %368 = vmatpush3.bf16.msra.mxu0 %v367_v6  ;;  %v376_v14 = vpack.c.bf16 %v158_v11, %v157_v10  ;;  %v68_v17 = vld [vmem:[#allocation3] sm:$0xff]  ;;  %v379_v18 = vpack.c.bf16 %v160_v16, %v159_v15  ;;  %v161_v19 = vld [vmem:[#allocation8 + $0x30] sm:$0xff]  ;;  %v163_v22 = vld [vmem:[#allocation8 + $0x40] sm:$0xff]  ;;  %vm269_vm2 = vcmp.lt.s32.totalorder %v268_v51, 64 }
  0x3e   :  { %369 = vmatprep.subr.bf16.mxu0 %v510_v1  ;;  %374 = vmatpush3.bf16.msra.mxu1 %v373_v13  ;;  %v162_v20 = vld [vmem:[#allocation8 + $0x38] sm:$0xff]  ;;  %v164_v23 = vld [vmem:[#allocation8 + $0x48] sm:$0xff]  ;;  %v165_v25 = vld [vmem:[#allocation8 + $0x50] sm:$0xff] }
  0x3f   :  { %375 = vmatprep.subr.bf16.mxu1 %v510_v1  ;;  %v382_v21 = vpack.c.bf16 %v162_v20, %v161_v19  ;;  %v385_v24 = vpack.c.bf16 %v164_v23, %v163_v22  ;;  %v166_v26 = vld [vmem:[#allocation8 + $0x58] sm:$0xff]  ;;  %v167_v28 = vld [vmem:[#allocation8 + $0x60] sm:$0xff]  ;;  %v168_v29 = vld [vmem:[#allocation8 + $0x68] sm:$0xff] }
  0x40   :  { %v388_v27 = vpack.c.bf16 %v166_v26, %v165_v25  ;;  %v391_v30 = vpack.c.bf16 %v168_v29, %v167_v28  ;;  %v169_v31 = vld [vmem:[#allocation8 + $0x70] sm:$0xff]  ;;  %v170_v32 = vld [vmem:[#allocation8 + $0x78] sm:$0xff] }
  0x41   :  { %371 = vmatpush3.bf16.msra.mxu0 %v370_v12  ;;  %v394_v33 = vpack.c.bf16 %v170_v32, %v169_v31  ;;  %v293_v34 = vld [vmem:[%s623_s2] ss:$0 sm:$0xff]  ;;  %s514_s2 = smov [#allocation9]  }
  0x42   :  { %377 = vmatpush3.bf16.msra.mxu1 %v376_v14  ;;  %v295_v39 = vld [vmem:[%s625_s4] ss:$0 sm:$0xff]  ;;  %s283_s4 = sshll.u32 %s514_s2, 4  ;;  %s284_s4 = int_to_ptr.vmem [resolvable:$true] %s283_s4 }
  0x43   :  { %378 = vmatprep.subr.bf16.mxu1 %v510_v1  ;;  %v296_v43 = vld [vmem:[%s626_s5] ss:$0 sm:$0xff]  ;;  %s477_s19 = scalar_lea.vmem %s284_s4, 128  ;;  %p482_p11 = scmp.lt.s32.totalorder %s284_s4, %s284_s4 }
  0x44   :  { %329 = vmatmul.mubr.msk.f32.vlgmr.msra.gmra.mrb[0].mxu0 %vm80_vm1, %v68_v17  ;;  %v297_v47 = vld [vmem:[#allocation2] ss:$0 sm:$0xff]  ;;  %p478_p10 = scmp.ne.s32.totalorder %s284_s4, %s477_s19  ;;  %p483_p12 = scmp.lt.s32.totalorder %s477_s19, %s477_s19 }
  0x46   :  { %380 = vmatpush3.bf16.msra.mxu1 %v379_v18  ;;  %p484_p13 = por %p483_p12, %p482_p11 }
  0x47   :  { %381 = vmatprep.subr.bf16.mxu1 %v510_v1 }
  0x48   :  { %p485_p0 = pnand %p484_p13, %p478_p10 }
  0x4a   :  { %383 = vmatpush3.bf16.msra.mxu1 %v382_v21 }
  0x4b   :  { %384 = vmatprep.subr.bf16.mxu1 %v510_v1 }
  0x4e   :  { %386 = vmatpush3.bf16.msra.mxu1 %v385_v24 }
  0x4f   :  { %387 = vmatprep.subr.bf16.mxu1 %v510_v1 }
  0x52   :  { %389 = vmatpush3.bf16.msra.mxu1 %v388_v27 }
  0x53   :  { %390 = vmatprep.subr.bf16.mxu1 %v510_v1 }
  0x56   :  { %392 = vmatpush3.bf16.msra.mxu1 %v391_v30 }
  0x57   :  { %393 = vmatprep.subr.bf16.mxu1 %v510_v1 }
  0x5a   :  { %395 = vmatpush3.bf16.msra.mxu1 %v394_v33 }
 0x117   :  { %v150_v35 = vpop.f32.mrb[0].mxu0 }
 0x118   :  { %v151_v36 = vadd.f32 %v293_v34, %v150_v35  ;;  %v330_v37 = vpop.f32.mrb[1].mxu0 }
 0x11a   :  { %407 = vtanh.f32 %v151_v36 }
 0x124   :  { %v408_v38 = vpop.eup %407 }
 0x125   :  { %364 = vmatmul.mubr.f32.vlgmr.msra.gmra.mrb[0].mxu1 %v408_v38 }
 0x1f8   :  { %v244_v40 = vpop.f32.mrb[0].mxu1 }
 0x1f9   :  { %v245_v41 = vadd.f32 %v295_v39, %v244_v40  ;;  %v365_v42 = vpop.f32.mrb[1].mxu1 }
 0x1fb   :  { %409 = vtanh.f32 %v245_v41 }
 0x205   :  { %v410_v44 = vpop.eup %409 }
 0x206   :  { %v256_v45 = vmul.f32 %v410_v44, %v296_v43 }
 0x208   :  { %257 = vadd.xlane.f32.xlu0 %v256_v45 }
 0x295   :  { %v258_v48 = vpop.xlane.xlu0 %257 }
 0x296   :  { %v266_v49 = vadd.f32 %v297_v47, %v258_v48 }
 0x298   :  { %272 = vperm.xlu0 %406, %v266_v49  }
 0x317   :  { %v273_v52 = vpop.permute.xlu0 %272 }
 0x318   :  { %v275_v53 = vsel %vm269_vm2, %v410_v44, %v273_v52 }
 0x319   :  { %276 = vst [vmem:[#allocation9] sm:$0xff] %v275_v53 }
 0x31a   :  { %488 = shalt.err (!%p485_p0)
}
 0x31b   :  { %s489_s21 = scalar_lea.hbm %s628_s7, 128 }
 0x31c   :  { %p490_p1 = scmp.ne.s32.totalorder %s628_s7, %s489_s21  ;;  %p493_p2 = scmp.lt.u32.totalorder %s489_s21, %s628_s7 }
 0x31e   :  { %p495_p3 = pnand %p493_p2, %p490_p1 }
 0x320   :  { %498 = shalt.err (!%p495_p3)
}
 0x321   :  { %286 = dma.vmem_to_hbm [thread:$0]  %s284_s4, 128, %s628_s7, [#allocation5]  }
 0x322   :  { %503 = dma.done.wait [#allocation5], 128  }
 0x323   :  { %504 = vsyncadd [#allocation5], 4294967168 }
 0x324   :  { %290 = vsyncpa [#allocation4], 1 }
 0x325   :  { %291 = vsyncpa [#allocation7], 1 }
 0x326   :  { %292 = vsyncpa [#allocation5], 1 }

</bundles_post_ra>
